<compile_context>
chip_gen: v7x
topology: tpu7x:2x2x1
jax: 0.10.0
libtpu: 0.0.40
codegen_flags: <defaults>
</compile_context>

<pallas_src>
import functools

import jax
import jax.numpy as jnp
from jax.experimental import pallas as pl
from jax.experimental.pallas import tpu as pltpu


def _layernorm_kernel(x_ref, w_ref, b_ref, o_ref, *, eps):
    # x_ref: (Nb, C, T) tile — channels on sublanes, spatial positions on lanes.
    # w_ref / b_ref: (C, 1) columns — broadcast over batch rows and lanes.
    x = x_ref[...].astype(jnp.float32)
    mean = jnp.mean(x, axis=1, keepdims=True)                    # reduce over channels
    centered = x - mean
    var = jnp.mean(centered * centered, axis=1, keepdims=True)   # unbiased=False
    std = jnp.sqrt(var)
    inv = 1.0 / (std + eps)        # exact divide: kernel is HBM-bound, this is free
    w = w_ref[...].astype(jnp.float32)                           # (C, 1)
    b = b_ref[...].astype(jnp.float32)
    o_ref[...] = (centered * inv * w + b).astype(o_ref.dtype)


def _round_up(v, m):
    return -(-v // m) * m


def _choose_blocks(N, C, HW, itemsize, tile_hw=None, block_n=None):
    """Byte-targeted block sizing with correct sublane/lane padding."""
    # Sublane packing of the channel axis in VMEM (f32 -> 8, bf16 -> 16, i8 -> 32).
    sublane = {4: 8, 2: 16, 1: 32}.get(itemsize, 8)
    c_pad = _round_up(C, sublane)

    # Target ~4 MiB of padded data per input tile.  With double-buffered
    # input + output this is a ~16 MiB working set: comfortably past the
    # ~1-2 MiB needed to approach HBM roofline, and safe on every generation
    # once vmem_limit_bytes is set explicitly (v5e/v6e: 128 MiB physical,
    # v7x: 64 MiB per TensorCore).
    target_tile_bytes = 4 << 20
    max_lanes = 32768

    def padded_tile_bytes(nb, t):
        return nb * c_pad * _round_up(max(t, 1), 128) * itemsize

    # --- spatial tile (lanes) ---
    if tile_hw is not None:
        tile = int(tile_hw)
        tile = HW if tile >= HW else max(128, (tile // 128) * 128)
    elif padded_tile_bytes(1, HW) >= target_tile_bytes or HW > max_lanes:
        lanes = target_tile_bytes // (c_pad * itemsize)
        tile = max(128, min(max_lanes, (lanes // 128) * 128))
        tile = HW if tile >= HW else tile
    else:
        # Whole spatial extent in one block (full-dim block: exempt from 128 rule).
        tile = HW

    # --- batch folding ---
    if block_n is not None:
        nb = max(1, min(int(block_n), N))
    elif tile == HW:
        nb = max(1, target_tile_bytes // padded_tile_bytes(1, HW))
        nb = min(nb, N)
    else:
        nb = 1

    # --- make sure a megacore (v7x) gets >= 2 parallel grid steps ---
    if tile_hw is None and block_n is None:
        grid_steps = (-(-N // nb)) * (-(-HW // tile))
        if grid_steps < 2:
            if N >= 2:
                nb = -(-N // 2)                      # split along batch
            elif HW > 128:
                tile = min(HW, max(128, _round_up(-(-HW // 2), 128)))

    # --- VMEM accounting: in + out double-buffered, plus padded weight/bias ---
    io_bytes = 2 * 2 * padded_tile_bytes(nb, tile)
    wb_bytes = 2 * 2 * c_pad * 128 * 4
    vmem_limit = int(min(56 << 20, max(24 << 20, io_bytes + wb_bytes + (8 << 20))))
    return nb, tile, vmem_limit


def layernorm_channel_first(x, weight, bias, *, eps=1e-6, tile_hw=None, block_n=None):
    """x: (N, C, H, W); weight/bias: (C,). Returns (N, C, H, W)."""
    N, C, H, W = x.shape
    HW = H * W
    itemsize = jnp.dtype(x.dtype).itemsize

    # Free, contiguous reshape — no transpose, no extra HBM pass.
    x3 = x.reshape(N, C, HW)
    w2 = weight.reshape(C, 1)
    b2 = bias.reshape(C, 1)

    nb, tile, vmem_limit = _choose_blocks(N, C, HW, itemsize, tile_hw, block_n)
    grid = (pl.cdiv(N, nb), pl.cdiv(HW, tile))

    kernel = functools.partial(_layernorm_kernel, eps=eps)

    out3 = pl.pallas_call(
        kernel,
        out_shape=jax.ShapeDtypeStruct((N, C, HW), x.dtype),
        grid_spec=pltpu.PrefetchScalarGridSpec(
            num_scalar_prefetch=0,
            grid=grid,
            in_specs=[
                # (Nb, C, tile): C = full channel axis on sublanes, spatial on lanes.
                pl.BlockSpec((nb, C, tile), lambda n, s: (n, 0, s)),
                pl.BlockSpec((C, 1), lambda n, s: (0, 0)),   # weight (broadcast)
                pl.BlockSpec((C, 1), lambda n, s: (0, 0)),   # bias   (broadcast)
            ],
            out_specs=pl.BlockSpec((nb, C, tile), lambda n, s: (n, 0, s)),
        ),
        compiler_params=pltpu.CompilerParams(
            dimension_semantics=("parallel", "parallel"),
            vmem_limit_bytes=vmem_limit,
        ),
    )(x3, w2, b2)

    return out3.reshape(N, C, H, W)


def _reference(x, weight, bias, eps=1e-6):
    mean = jnp.mean(x, axis=1, keepdims=True)
    var = jnp.mean((x - mean) ** 2, axis=1, keepdims=True)
    std = jnp.sqrt(var)
    xh = (x - mean) / (std + eps)
    return xh * weight[None, :, None, None] + bias[None, :, None, None]


def _check(x, weight, bias, *, eps=1e-6, tile_hw=None, block_n=None):
    out = jax.block_until_ready(
        layernorm_channel_first(x, weight, bias, eps=eps, tile_hw=tile_hw, block_n=block_n)
    )
    ref = _reference(x, weight, bias, eps=eps)
    assert out.shape == x.shape
    assert jnp.allclose(out, ref, atol=1e-5, rtol=1e-5), float(
        jnp.max(jnp.abs(out - ref))
    )


if __name__ == "__main__":
    key = jax.random.PRNGKey(0)
    k1, k2, k3, k4, kw, kb = jax.random.split(key, 6)

    # Main case matching the module's typical use (small shapes).
    N, C, H, W = 2, 4, 16, 16
    x = jax.random.normal(k1, (N, C, H, W), dtype=jnp.float32)
    weight = jnp.ones((C,), dtype=jnp.float32)   # nn.Parameter(torch.ones(C))
    bias = jnp.zeros((C,), dtype=jnp.float32)    # nn.Parameter(torch.zeros(C))
    _check(x, weight, bias)

    # Realistic ConvNeXt channel count, tiny non-128 spatial extent
    # (full-lane-dim block + batch-fold path).
    C2 = 96
    x2 = jax.random.normal(k2, (1, C2, 5, 7), dtype=jnp.float32)
    w2 = 1.0 + 0.1 * jax.random.normal(kw, (C2,), dtype=jnp.float32)
    b2 = 0.1 * jax.random.normal(kb, (C2,), dtype=jnp.float32)
    _check(x2, w2, b2)

    # Force the partial-last-spatial-block path (HW=240 with a 128-lane tile).
    C3 = 8
    x3 = jax.random.normal(k3, (1, C3, 12, 20), dtype=jnp.float32)
    _check(x3, jnp.ones((C3,), jnp.float32), jnp.zeros((C3,), jnp.float32),
           tile_hw=128, block_n=1)

    # Force the partial-last-batch-block path (N=3 with a 2-image block).
    x4 = jax.random.normal(k4, (3, 4, 16, 16), dtype=jnp.float32)
    _check(x4, jnp.ones((4,), jnp.float32), jnp.zeros((4,), jnp.float32), block_n=2)

    print("KERNEL_OK")
</pallas_src>

<mosaic_0001>
module attributes {stable_mosaic.version = 11 : i64} {
  func.func @_layernorm_kernel(%arg0: i32, %arg1: i32, %arg2: memref<1x4x256xf32, #tpu.memory_space<vmem>>, %arg3: memref<4x1xf32, #tpu.memory_space<vmem>>, %arg4: memref<4x1xf32, #tpu.memory_space<vmem>>, %arg5: memref<1x4x256xf32, #tpu.memory_space<vmem>>) attributes {dimension_semantics = [#tpu.dimension_semantics<parallel>, #tpu.dimension_semantics<parallel>], iteration_bounds = array<i64: 2, 1>, scalar_prefetch = 0 : i64, scratch_operands = 0 : i64, tpu.core_type = #tpu.core_type<tc>, window_params = [{transform_indices = @transform_0, window_bounds = array<i64: 1, 4, 256>}, {pipeline_mode = #tpu.pipeline_mode<synchronous>, transform_indices = @transform_1, window_bounds = array<i64: 4, 1>}, {pipeline_mode = #tpu.pipeline_mode<synchronous>, transform_indices = @transform_2, window_bounds = array<i64: 4, 1>}, {transform_indices = @transform_3, window_bounds = array<i64: 1, 4, 256>}]} {
    %c0 = arith.constant 0 : index
    %c0_0 = arith.constant 0 : index
    %c0_1 = arith.constant 0 : index
    %0 = vector.load %arg2[%c0, %c0_0, %c0_1] : memref<1x4x256xf32, #tpu.memory_space<vmem>>, vector<1x4x256xf32>
    %cst = arith.constant dense<0.000000e+00> : vector<1x256xf32>
    %1 = vector.multi_reduction <add>, %0, %cst [1] : vector<1x4x256xf32> to vector<1x256xf32>
    %2 = vector.shape_cast %1 : vector<1x256xf32> to vector<1x1x256xf32>
    %cst_2 = arith.constant 4.000000e+00 : f32
    %3 = vector.broadcast %cst_2 : f32 to vector<1x1x256xf32>
    %4 = arith.divf %2, %3 : vector<1x1x256xf32>
    %5 = vector.broadcast %4 : vector<1x1x256xf32> to vector<1x4x256xf32>
    %6 = arith.subf %0, %5 : vector<1x4x256xf32>
    %7 = arith.mulf %6, %6 : vector<1x4x256xf32>
    %cst_3 = arith.constant dense<0.000000e+00> : vector<1x256xf32>
    %8 = vector.multi_reduction <add>, %7, %cst_3 [1] : vector<1x4x256xf32> to vector<1x256xf32>
    %9 = vector.shape_cast %8 : vector<1x256xf32> to vector<1x1x256xf32>
    %cst_4 = arith.constant 4.000000e+00 : f32
    %10 = vector.broadcast %cst_4 : f32 to vector<1x1x256xf32>
    %11 = arith.divf %9, %10 : vector<1x1x256xf32>
    %12 = math.sqrt %11 : vector<1x1x256xf32>
    %cst_5 = arith.constant 9.99999997E-7 : f32
    %13 = vector.broadcast %cst_5 : f32 to vector<1x1x256xf32>
    %14 = arith.addf %12, %13 : vector<1x1x256xf32>
    %cst_6 = arith.constant 1.000000e+00 : f32
    %15 = vector.broadcast %cst_6 : f32 to vector<1x1x256xf32>
    %16 = arith.divf %15, %14 : vector<1x1x256xf32>
    %c0_7 = arith.constant 0 : index
    %c0_8 = arith.constant 0 : index
    %17 = vector.load %arg3[%c0_7, %c0_8] : memref<4x1xf32, #tpu.memory_space<vmem>>, vector<4x1xf32>
    %c0_9 = arith.constant 0 : index
    %c0_10 = arith.constant 0 : index
    %18 = vector.load %arg4[%c0_9, %c0_10] : memref<4x1xf32, #tpu.memory_space<vmem>>, vector<4x1xf32>
    %19 = vector.broadcast %16 : vector<1x1x256xf32> to vector<1x4x256xf32>
    %20 = arith.mulf %6, %19 : vector<1x4x256xf32>
    %21 = vector.shape_cast %17 : vector<4x1xf32> to vector<1x4x1xf32>
    %22 = vector.broadcast %21 : vector<1x4x1xf32> to vector<1x4x256xf32>
    %23 = arith.mulf %20, %22 : vector<1x4x256xf32>
    %24 = vector.shape_cast %18 : vector<4x1xf32> to vector<1x4x1xf32>
    %25 = vector.broadcast %24 : vector<1x4x1xf32> to vector<1x4x256xf32>
    %26 = arith.addf %23, %25 : vector<1x4x256xf32>
    %c0_11 = arith.constant 0 : index
    %c0_12 = arith.constant 0 : index
    %c0_13 = arith.constant 0 : index
    %27 = vector.load %arg5[%c0_11, %c0_12, %c0_13] : memref<1x4x256xf32, #tpu.memory_space<vmem>>, vector<1x4x256xf32>
    tpu.vector_store %arg5[%c0_11, %c0_12, %c0_13], %26 {strides = array<i32>} : memref<1x4x256xf32, #tpu.memory_space<vmem>>, vector<1x4x256xf32>,
    return
  }
  func.func @transform_0(%arg0: i32, %arg1: i32) -> (i32, i32, i32) {
    %c0_i32 = arith.constant 0 : i32
    %c0_i32_0 = arith.constant 0 : i32
    return %arg0, %c0_i32, %arg1 : i32, i32, i32
  }
  func.func @transform_1(%arg0: i32, %arg1: i32) -> (i32, i32) {
    %c0_i32 = arith.constant 0 : i32
    %c0_i32_0 = arith.constant 0 : i32
    %c0_i32_1 = arith.constant 0 : i32
    return %c0_i32, %c0_i32_0 : i32, i32
  }
  func.func @transform_2(%arg0: i32, %arg1: i32) -> (i32, i32) {
    %c0_i32 = arith.constant 0 : i32
    %c0_i32_0 = arith.constant 0 : i32
    %c0_i32_1 = arith.constant 0 : i32
    return %c0_i32, %c0_i32_0 : i32, i32
  }
  func.func @transform_3(%arg0: i32, %arg1: i32) -> (i32, i32, i32) {
    %c0_i32 = arith.constant 0 : i32
    %c0_i32_0 = arith.constant 0 : i32
    return %arg0, %c0_i32, %arg1 : i32, i32, i32
  }
}

</mosaic_0001>

<bundles_post_ra>
// kernel: tpu_custom_call.1
= control target key start
LH: loop header
LB: loop body
LE: loop exit
PB: predicated region body
PF: predicated region fallthrough
CT: control target
= control target key end

     0   :  { %8 = vsyncpa [#allocation3], 0  ;;  %s824_s0 = inlined_call_operand.hbm [shape: f32[2,4,256], index: 0, kind: input, shape index: {}]   ;;  %s825_s1 = inlined_call_operand.vmem [shape: f32[4,1], index: 1, kind: input, shape index: {}]   ;;  %s826_s2 = inlined_call_operand.vmem [shape: f32[4,1], index: 2, kind: input, shape index: {}]   ;;  %s827_s3 = inlined_call_operand.hbm [shape: f32[2,4,256], index: 3, kind: output, shape index: {}]  }
   0x1   :  { %10 = vsyncpa [#allocation3 + $0x1], 0 }
   0x2   :  { %11 = vsyncpa [#allocation4], 0 }
   0x3   :  { %13 = vsyncpa [#allocation4 + $0x1], 0  ;;  %s638_s12 = smov 0   ;;  %s640_s13 = smov 0  }
   0x4   :  { %s642_s14 = smov 0   ;;  %s644_s15 = smov 0  }
   0x5   :  { %s646_s16 = smov 0   ;;  %s648_s17 = smov 0  }
   0x6 LB: > { %s409_s18 = sadd.s32 4294967295, %s612_s17   ;;  %s410_s19 = sadd.s32 4294967294, %s612_s17   ;;  %s612_s17 = sphi %s648_s17, %s19_s17   ;;  %s608_s16 = sphi %s646_s16, %s843_s16   ;;  %s604_s15 = sphi %s644_s15, %s842_s15   ;;  %s600_s14 = sphi %s642_s14, %s841_s14   ;;  %s596_s13 = sphi %s640_s13, %s840_s13   ;;  %s592_s12 = sphi %s638_s12, %s839_s12  }
   0x7   : > { %s31_s20 = sadd.s32 1, %s608_s16  ;;  %s40_s21 = sadd.s32 1, %s600_s14 }
   0x8   : > { %p33_p0 = scmp.ge.s32.totalorder %s31_s20, 2  ;;  %p47_p1 = scmp.ne.s32.totalorder %s600_s14, %s596_s13 }
   0x9   : > { %p48_p2 = scmp.eq.s32.totalorder %s612_s17, 0  ;;  %p53_p3 = scmp.ne.s32.totalorder %s596_s13, %s592_s12 }
   0xa   : > { %s845_s20 = smov (%p33_p0, %s31_s20), 0  ;;  %p54_p5 = scmp.eq.s32.totalorder %s409_s18, 0 }
   0xb   : > { %p679_p4 = por %p48_p2, %p47_p1  ;;  %s35_s23 = ssub.s32 %s608_s16, %s845_s20 }
   0xc   : > { %p121_p6 = scmp.eq.s32.totalorder %s409_s18, 1  ;;  %p38_p7 = scmp.eq.s32.totalorder %s35_s23, 0 }
   0xd   : > { %p685_p8 = por %p54_p5, %p53_p3  ;;  %p127_p10 = scmp.eq.s32.totalorder %s410_s19, 1 }
   0xe   : > { %p689_p9 = por %p121_p6, %p47_p1  ;;  %p438_p13 = scmp.lt.s32.totalorder %s612_s17, 2 }
   0xf   : > { %s694_s26 = scalar_select %p38_p7, %s600_s14, %s40_s21  }
  0x10   : > { %s831_s25 = scalar_select %p689_p9, 1, 0 }
  0x11   : > { %p696_p11 = por %p127_p10, %p53_p3  ;;  %s153_s28 = sand.u32 1, %s600_s14  }
  0x12   : > { %s413_s29 = sshll.u32 %s153_s28, 3  ;;  %s424_s30 = sshll.u32 %s608_s16, 7 }
  0x13   : > { %s832_s27 = scalar_select %p696_p11, 1, 0 }
  0x14   : > { %s707_s6 = scalar_lea.hbm %s824_s0, %s424_s30  ;;  %s157_s7 = scalar_lea.vmem [#allocation2], %s413_s29 }
  0x15   : > { %s167_s8 = sshll.u32 %s157_s7, 4  ;;  %p713_p0 = pnand %p438_p13, %p679_p4  ;;  %s709_s8 = int_to_ptr.vmem [resolvable:$true] %s167_s8 }
  0x16   : > { %s154_s10 = scalar_lea.sflag [#allocation3], %s153_s28  ;;  %s500_s11 = scalar_lea.hbm %s707_s6, 128 }
  0x17   : > { %p501_p3 = scmp.ne.s32.totalorder %s707_s6, %s500_s11  ;;  %p502_p5 = pneg %p713_p0 }
  0x18   : > { %s505_s21 = scalar_lea.hbm %s824_s0, 256  ;;  %p506_p4 = scmp.lt.u32.totalorder %s707_s6, %s824_s0 }
  0x19   : > { %p503_p6 = pnand %p502_p5, %p501_p3  ;;  %p507_p10 = scmp.lt.u32.totalorder %s505_s21, %s500_s11 }
  0x1a   : > { %p509_p12 = scmp.lt.u32.totalorder %s500_s11, %s707_s6 }
  0x1b   : > { %p504_p7 = pneg %p503_p6  ;;  %p508_p13 = por %p507_p10, %p506_p4 }
  0x1d   : > { %p510_p1 = por %p509_p12, %p508_p13 }
  0x1f   : > { %p511_p2 = pnand %p510_p1, %p504_p7 }
  0x21   : > { %514 = shalt.err (!%p511_p2)
}
  0x22   : > { %s515_s28 = scalar_lea.vmem %s709_s8, 128  ;;  %s614_s29 = smov [#allocation2]  }
  0x23   : > { %p516_p3 = scmp.ne.s32.totalorder %s709_s8, %s515_s28  ;;  %s520_s30 = sshll.u32 %s614_s29, 4  ;;  %s521_s30 = int_to_ptr.vmem [resolvable:$false] %s520_s30 }
  0x24   : > { %s522_s4 = scalar_lea.vmem %s521_s30, 256  ;;  %p523_p9 = scmp.lt.s32.totalorder %s709_s8, %s521_s30 }
  0x25   : > { %p518_p6 = pnand %p516_p3, %p502_p5  ;;  %p524_p4 = scmp.lt.s32.totalorder %s522_s4, %s515_s28 }
  0x27   : > { %p519_p11 = pneg %p518_p6  ;;  %p525_p10 = por %p524_p4, %p523_p9 }
  0x29   : > { %p526_p12 = pnand %p525_p10, %p519_p11 }
  0x2b   : > { %529 = shalt.err (!%p526_p12)
}
  0x2c   : > { %433 = dma.hbm_to_vmem [thread:$0]  (!%p713_p0), %s707_s6, 128, %s709_s8, %s154_s10  }
  0x2d   : > { %p834_p1 = scmp.lt.s32.totalorder %s612_s17, 3  ;;  %p835_p2 = scmp.ge.s32.totalorder %s612_s17, 1 }
  0x2f   : > { %p173_p5 = pnand %p835_p2, %p834_p1 }
  0x30   : > { %s749_s5 = sand.u32 (!%p173_p5), 1, %s596_s13  }
  0x31   : > { %176 = sbr.rel (%p173_p5) target bundleno = 209 (0xd1), region = 32  ;;  %s417_s7 = sshll.u32 (!%p173_p5), %s749_s5, 3 }
  0x32   : > { %s179_s11 = scalar_lea.sflag (!%p173_p5), [#allocation3], %s749_s5  ;;  %s182_s9 = scalar_lea.vmem (!%p173_p5), [#allocation2], %s417_s7 }
  0x38   : > { %583 = dma.done.wait (%p685_p8), %s179_s11, 128  }
  0x39   : > { %585 = vsyncadd (%p685_p8), %s179_s11, 4294967168  ;;  %v615_v0 = vmov 0   ;;  %v274_v1 = vld [vmem:[%s825_s1] sm:$0xf]  ;;  %vm211_vm0 = vcmask 1043456   ;;  %v288_v55 = vlaneseq  ;;  %s425_s24 = sshll.u32 %s604_s15, 7 }
  0x3a   : > { %490 = vset.pattern.permute.xlu0 %v615_v0  ;;  %v207_v2 = vld [vmem:[%s182_s9] sm:$0xff]  ;;  %v616_v53 = vmov 839922192   ;;  %s204_s19 = scalar_lea.vmem [#allocation5], %s417_s7  ;;  %s775_s28 = scalar_lea.hbm %s827_s3, %s425_s24 }
  0x3b   : > { %283 = vperm.xlu0 %490, %v274_v1   ;;  %v275_v3 = vld [vmem:[%s826_s2] sm:$0xf]  ;;  %v209_v4 = vcombine.high %v207_v2, %v207_v2  ;;  %v212_v5 = vsel %vm211_vm0, %v207_v2, 0.0  ;;  %v286_v54 = vunpack.c.l.s4 %v616_v53  ;;  %v289_v58 = vshrl.u32 %v288_v55, 7  ;;  %s325_s21 = sshll.u32 %s204_s19, 4  ;;  %s309_s29 = scalar_lea.sflag [#allocation4], %s749_s5  ;;  %s777_s21 = int_to_ptr.vmem [resolvable:$true] %s325_s21 }
  0x3c   : > { %v213_v7 = vrot.slane %v212_v5, 4  ;;  %s530_s30 = scalar_lea.vmem %s777_s21, 128  ;;  %p836_p9 = scmp.ne.s32.totalorder %s831_s25, 0 }
  0x3d   : > { %v219_v6 = vsel %vm211_vm0, %v209_v4, 0.0  ;;  %v287_v57 = vunpack.c.0.s8 %v286_v54  ;;  %p531_p8 = scmp.ne.s32.totalorder %s777_s21, %s530_s30  ;;  %s617_s15 = smov [#allocation5]  }
  0x3e   : > { %v220_v8 = vrot.slane %v219_v6, 4  ;;  %v214_v9 = vadd.f32 %v213_v7, %v212_v5  ;;  %s534_s4 = sshll.u32 %s617_s15, 4  ;;  %s535_s4 = int_to_ptr.vmem [resolvable:$false] %s534_s4 }
  0x3f   : > { %296 = vperm.xlu0 %490, %v275_v3   ;;  %v290_v60 = vsub.s32 %v287_v57, %v289_v58  ;;  %p532_p11 = pnand %p531_p8, %p836_p9  ;;  %s536_s7 = scalar_lea.vmem %s535_s4, 256 }
  0x40   : > { %v221_v10 = vadd.f32 %v220_v8, %v219_v6  ;;  %v215_v11 = vrot.slane %v214_v9, 2  ;;  %p537_p7 = scmp.lt.s32.totalorder %s777_s21, %s535_s4  ;;  %p538_p13 = scmp.lt.s32.totalorder %s536_s7, %s530_s30 }
  0x41   : > { %p533_p0 = pneg %p532_p11 }
  0x42   : > { %v222_v12 = vrot.slane %v221_v10, 2  ;;  %v216_v13 = vadd.f32 %v215_v11, %v214_v9  ;;  %p539_p3 = por %p538_p13, %p537_p7 }
  0x44   : > { %v223_v14 = vadd.f32 %v222_v12, %v221_v10  ;;  %v217_v15 = vrot.slane %v216_v13, 1  ;;  %p540_p6 = pnand %p539_p3, %p533_p0 }
  0x46   : > { %v224_v16 = vrot.slane %v223_v14, 1  ;;  %v218_v17 = vadd.f32 %v217_v15, %v216_v13 }
  0x48   : > { %v225_v18 = vadd.f32 %v224_v16, %v223_v14  ;;  %v227_v19 = vmul.f32 0.25, %v218_v17 }
  0x4a   : > { %v228_v20 = vmul.f32 0.25, %v225_v18 }
  0x4c   : > { %v231_v21 = vcombine.low %v227_v19, %v228_v20 }
  0x4e   : > { %v233_v22 = vsub.f32 %v207_v2, %v231_v21 }
  0x50   : > { %v234_v23 = vmul.f32 %v233_v22, %v233_v22 }
  0x52   : > { %v236_v24 = vcombine.high %v234_v23, %v234_v23  ;;  %v238_v25 = vsel %vm211_vm0, %v234_v23, 0.0 }
  0x53   : > { %v239_v27 = vrot.slane %v238_v25, 4 }
  0x54   : > { %v245_v26 = vsel %vm211_vm0, %v236_v24, 0.0 }
  0x55   : > { %v246_v28 = vrot.slane %v245_v26, 4  ;;  %v240_v29 = vadd.f32 %v239_v27, %v238_v25 }
  0x57   : > { %v247_v30 = vadd.f32 %v246_v28, %v245_v26  ;;  %v241_v31 = vrot.slane %v240_v29, 2 }
  0x59   : > { %v248_v32 = vrot.slane %v247_v30, 2  ;;  %v242_v33 = vadd.f32 %v241_v31, %v240_v29 }
  0x5b   : > { %v249_v34 = vadd.f32 %v248_v32, %v247_v30  ;;  %v243_v35 = vrot.slane %v242_v33, 1 }
  0x5d   : > { %v250_v36 = vrot.slane %v249_v34, 1  ;;  %v244_v37 = vadd.f32 %v243_v35, %v242_v33 }
  0x5f   : > { %v251_v38 = vadd.f32 %v250_v36, %v249_v34  ;;  %v252_v39 = vmul.f32 0.25, %v244_v37 }
  0x61   : > { %v253_v40 = vmul.f32 0.25, %v251_v38  ;;  %492 = vrsqrt.f32 %v252_v39  ;;  %vm256_vm1 = vcmp.eq.f32.partialorder %v252_v39, inf  ;;  %v259_v45 = vand.u32 2147483648, %v252_v39 }
  0x62   : > { %vm258_vm3 = vcmp.eq.f32.partialorder %v252_v39, 0.0 }
  0x63   : > { %494 = vrsqrt.f32 %v253_v40  ;;  %vm263_vm2 = vcmp.eq.f32.partialorder %v253_v40, inf  ;;  %v266_v47 = vand.u32 2147483648, %v253_v40  ;;  %vm265_vm4 = vcmp.eq.f32.partialorder %v253_v40, 0.0 }
  0x6b   : > { %v493_v41 = vpop.eup %492 }
  0x6c   : > { %v255_v43 = vmul.f32 %v493_v41, %v252_v39 }
  0x6d   : > { %v495_v42 = vpop.eup %494 }
  0x6e   : > { %v262_v44 = vmul.f32 %v495_v42, %v253_v40  ;;  %v257_v46 = vsel %vm256_vm1, %v252_v39, %v255_v43 }
  0x6f   : > { %v260_v49 = vsel %vm258_vm3, %v259_v45, %v257_v46 }
  0x70   : > { %v264_v48 = vsel %vm263_vm2, %v253_v40, %v262_v44  ;;  %v268_v51 = vadd.f32 1e-06, %v260_v49 }
  0x71   : > { %v267_v50 = vsel %vm265_vm4, %v266_v47, %v264_v48 }
  0x72   : > { %v269_v52 = vadd.f32 1e-06, %v267_v50  ;;  %496 = vrcp.f32 %v268_v51 }
  0x74   : > { %498 = vrcp.f32 %v269_v52 }
  0x7c   : > { %v497_v56 = vpop.eup %496 }
  0x7e   : > { %v499_v59 = vpop.eup %498 }
  0x7f   : > { %v278_v61 = vcombine.low %v497_v56, %v499_v59 }
  0x81   : > { %v280_v63 = vmul.f32 %v278_v61, %v233_v22 }
  0xba   : > { %v284_v62 = vpop.permute.xlu0 %283 }
  0xbb   : > { %v291_v0 = vrot.slane %v284_v62, %v290_v60 }
  0xbd   : > { %v293_v2 = vmul.f32 %v291_v0, %v280_v63 }
  0xbe   : > { %v297_v1 = vpop.permute.xlu0 %296 }
  0xbf   : > { %v304_v3 = vrot.slane %v297_v1, %v290_v60 }
  0xc1   : > { %v306_v4 = vadd.f32 %v304_v3, %v293_v2 }
  0xc3   : > { %307 = vst [vmem:[%s204_s19] sm:$0xff] %v306_v4 }
  0xc4   : > { %543 = shalt.err (!%p540_p6)
}
  0xc5   : > { %s544_s5 = scalar_lea.hbm %s775_s28, 128  ;;  %s548_s6 = scalar_lea.hbm %s827_s3, 256 }
  0xc6   : > { %p545_p4 = scmp.ne.s32.totalorder %s775_s28, %s544_s5  ;;  %p549_p1 = scmp.lt.u32.totalorder %s775_s28, %s827_s3 }
  0xc7   : > { %p550_p2 = scmp.lt.u32.totalorder %s548_s6, %s544_s5  ;;  %p552_p8 = scmp.lt.u32.totalorder %s544_s5, %s775_s28 }
  0xc8   : > { %p546_p10 = pnand %p545_p4, %p836_p9 }
  0xc9   : > { %p551_p5 = por %p550_p2, %p549_p1 }
  0xca   : > { %p547_p12 = pneg %p546_p10 }
  0xcb   : > { %p553_p11 = por %p552_p8, %p551_p5 }
  0xcd   : > { %p554_p0 = pnand %p553_p11, %p547_p12 }
  0xcf   : > { %557 = shalt.err (!%p554_p0)
}
  0xd0   : > { %428 = dma.vmem_to_hbm [thread:$0]  (%p836_p9), %s777_s21, 128, %s775_s28, %s309_s29  }
  0xd1 PF: > { %s337_s18 = sand.u32 1, %s592_s12   ;;  %p837_p7 = scmp.ne.s32.totalorder %s832_s27, 0 }
  0xd2   : > { %p838_p13 = scmp.ge.s32.totalorder %s612_s17, 2  ;;  %s338_s24 = scalar_lea.sflag [#allocation4], %s337_s18 }
  0xd4   : > { %p435_p3 = pnand %p838_p13, %p837_p7 }
  0xd6   : > { %587 = dma.done.wait (!%p435_p3), %s338_s24, 128  }
  0xd7   : > { %589 = vsyncadd (!%p435_p3), %s338_s24, 4294967168  ;;  %s19_s17 = sadd.s32 1, %s612_s17   ;;  %s839_s12 = smov %s596_s13 }
  0xd8   : > { %p16_p6 = scmp.ge.s32.totalorder %s19_s17, 4   ;;  %s840_s13 = smov %s600_s14 }
  0xd9   : > { %s841_s14 = smov %s694_s26  ;;  %s842_s15 = smov %s608_s16 }
  0xda   : > { %s843_s16 = smov %s845_s20  ;;  %18 = sbr.rel (!%p16_p6) target bundleno = 6 (0x6), region = 77 }
  0xe1   :  { %343 = vsyncpa [#allocation3], 1 }
  0xe2   :  { %345 = vsyncpa [#allocation3 + $0x1], 1 }
  0xe3   :  { %346 = vsyncpa [#allocation4], 1 }
  0xe4   :  { %348 = vsyncpa [#allocation4 + $0x1], 1 }

</bundles_post_ra>
